<compile_context>
chip_gen: v7x
topology: tpu7x:2x2x1
jax: 0.10.0
libtpu: 0.0.40
codegen_flags: <defaults>
</compile_context>

<pallas_src>
import functools

import jax
import jax.numpy as jnp
from jax.experimental import pallas as pl
from jax.experimental.pallas import tpu as pltpu

HIDDEN = 200        # logical hidden size of the PyTorch module
HIDDEN_PAD = 256    # padded hidden size (MXU / lane aligned)
LANE = 128          # TPU lane width
NEG_BIG = -1e30     # bias for padded logit columns (vanishes in logsumexp)


def _round_up(n, m):
    return ((n + m - 1) // m) * m


def _cdiv(a, b):
    return (a + b - 1) // b


def qnet_kernel(x_ref, w1_ref, b1_ref, w2_ref, b2_ref, w3_ref, b3_ref, out_ref):
    # Cast f32 x -> bf16 inside the kernel (no separate wrapper cast pass).
    x = x_ref[...].astype(jnp.bfloat16)

    def sigmoid(z):
        # Single-transcendental (EUP tanh) form of the logistic, f32.
        return 0.5 * jnp.tanh(0.5 * z) + 0.5

    # linear_1 + sigmoid (f32 accumulate / f32 elementwise)
    h = jnp.dot(x, w1_ref[...], preferred_element_type=jnp.float32) + b1_ref[...]
    h = sigmoid(h).astype(jnp.bfloat16)

    # linear_2 + sigmoid
    h = jnp.dot(h, w2_ref[...], preferred_element_type=jnp.float32) + b2_ref[...]
    h = sigmoid(h).astype(jnp.bfloat16)

    # linear_3 (padded logit columns carry bias -1e30, zero weight columns)
    logits = jnp.dot(h, w3_ref[...], preferred_element_type=jnp.float32) + b3_ref[...]

    # log_softmax over the last axis, numerically stable, f32.  Padded columns
    # (-1e30) never win the max and exp() to exactly 0, so they do not affect
    # the logsumexp of the real columns.
    m = jnp.max(logits, axis=-1, keepdims=True)
    shifted = logits - m
    lse = jnp.log(jnp.sum(jnp.exp(shifted), axis=-1, keepdims=True))
    out_ref[...] = (shifted - lse).astype(out_ref.dtype)


def prepare_params(params):
    """Pad hidden 200->256 (zeros) and num_t->128 lanes; bf16 weights, f32 biases.

    Padded w3 columns are zero and padded b3 entries are -1e30 so the padded
    logits vanish in the log_softmax max / logsumexp.
    """
    hpad = HIDDEN_PAD - HIDDEN
    num_t = params["w3"].shape[1]
    tpad = _round_up(num_t, LANE) - num_t

    w1p = jnp.pad(params["w1"], ((0, 0), (0, hpad))).astype(jnp.bfloat16)
    b1p = jnp.pad(params["b1"], ((0, 0), (0, hpad))).astype(jnp.float32)
    w2p = jnp.pad(params["w2"], ((0, hpad), (0, hpad))).astype(jnp.bfloat16)
    b2p = jnp.pad(params["b2"], ((0, 0), (0, hpad))).astype(jnp.float32)
    w3p = jnp.pad(params["w3"], ((0, hpad), (0, tpad))).astype(jnp.bfloat16)
    b3p = jnp.pad(params["b3"].astype(jnp.float32), ((0, 0), (0, tpad)),
                  constant_values=NEG_BIG)
    return {"w1": w1p, "b1": b1p, "w2": w2p, "b2": b2p, "w3": w3p, "b3": b3p}


@functools.partial(jax.jit, static_argnames=("num_t", "tile_b"))
def qnetwork_forward(x, prep, num_t, tile_b=1024):
    """x: (batch, x_dim) float32. prep: output of prepare_params. num_t: static."""
    batch, x_dim = x.shape
    num_t_pad = prep["w3"].shape[1]          # lane-padded logit width (>=128)

    # Balanced batch tiles; keep >=2 tiles so both v7x TensorCores get work.
    num_tiles = _cdiv(batch, tile_b)
    if num_tiles == 1 and batch >= 16:
        num_tiles = 2
    tb = _round_up(_cdiv(batch, num_tiles), 8)
    padded_batch = num_tiles * tb            # output rows (input is NOT padded;
                                             # boundary block reads are clamped)

    const = lambda shape: pl.BlockSpec(shape, lambda i: (0, 0))

    out = pl.pallas_call(
        qnet_kernel,
        out_shape=jax.ShapeDtypeStruct((padded_batch, num_t_pad), jnp.float32),
        grid=(num_tiles,),
        in_specs=[
            pl.BlockSpec((tb, x_dim), lambda i: (i, 0)),   # x tile (pipelined)
            const((x_dim, HIDDEN_PAD)),                    # w1 (VMEM-resident)
            const((1, HIDDEN_PAD)),                        # b1
            const((HIDDEN_PAD, HIDDEN_PAD)),               # w2
            const((1, HIDDEN_PAD)),                        # b2
            const((HIDDEN_PAD, num_t_pad)),                # w3
            const((1, num_t_pad)),                         # b3
        ],
        out_specs=pl.BlockSpec((tb, num_t_pad), lambda i: (i, 0)),
        compiler_params=pltpu.CompilerParams(
            dimension_semantics=("parallel",)),
    )(x, prep["w1"], prep["b1"], prep["w2"], prep["b2"], prep["w3"], prep["b3"])

    return out[:batch, :num_t]


def init_params(key, x_dim, num_t, hidden=HIDDEN):
    """Deterministic init mimicking torch.nn.Linear default (uniform +-1/sqrt(fan_in)).
    Weights stored transposed: (in_features, out_features). All f32."""
    ks = jax.random.split(key, 6)

    def lin(kw, kb, fan_in, fan_out):
        bound = 1.0 / jnp.sqrt(fan_in)
        w = jax.random.uniform(kw, (fan_in, fan_out), jnp.float32, -bound, bound)
        b = jax.random.uniform(kb, (1, fan_out), jnp.float32, -bound, bound)
        return w, b

    w1, b1 = lin(ks[0], ks[1], x_dim, hidden)
    w2, b2 = lin(ks[2], ks[3], hidden, hidden)
    w3, b3 = lin(ks[4], ks[5], hidden, num_t)
    return {"w1": w1, "b1": b1, "w2": w2, "b2": b2, "w3": w3, "b3": b3}


def _ref_mixed(x, p):
    """Plain-JAX reference with the same mixed precision / sigmoid form as the kernel."""
    def sig(z):
        return 0.5 * jnp.tanh(0.5 * z) + 0.5
    w1 = p["w1"].astype(jnp.bfloat16)
    w2 = p["w2"].astype(jnp.bfloat16)
    w3 = p["w3"].astype(jnp.bfloat16)
    h = sig(jnp.dot(x.astype(jnp.bfloat16), w1,
                    preferred_element_type=jnp.float32) + p["b1"]).astype(jnp.bfloat16)
    h = sig(jnp.dot(h, w2,
                    preferred_element_type=jnp.float32) + p["b2"]).astype(jnp.bfloat16)
    logits = jnp.dot(h, w3, preferred_element_type=jnp.float32) + p["b3"]
    return jax.nn.log_softmax(logits, axis=1)


def _ref_f32(x, p):
    """Pure-f32 reference (original module semantics)."""
    h = jax.nn.sigmoid(x @ p["w1"] + p["b1"])
    h = jax.nn.sigmoid(h @ p["w2"] + p["b2"])
    return jax.nn.log_softmax(h @ p["w3"] + p["b3"], axis=1)


if __name__ == "__main__":
    key = jax.random.PRNGKey(0)
    k_x, k_p, k_x2 = jax.random.split(key, 3)

    x_dim, num_t = 32, 8
    params = init_params(k_p, x_dim, num_t)
    prep = prepare_params(params)

    # Small batch (single grid step, no row padding).
    x = jax.random.normal(k_x, (8, x_dim), jnp.float32)
    out = jax.block_until_ready(qnetwork_forward(x, prep, num_t))
    assert out.shape == (8, num_t)
    assert jnp.allclose(out, _ref_mixed(x, params), atol=2e-3, rtol=2e-3)
    assert jnp.allclose(out, _ref_f32(x, params), atol=5e-2, rtol=5e-2)

    # Larger, non-multiple batch: exercises balanced 2-tile grid (2 x 152 rows,
    # last tile partially out of bounds on the input) + output column slicing.
    x2 = jax.random.normal(k_x2, (300, x_dim), jnp.float32)
    out2 = jax.block_until_ready(qnetwork_forward(x2, prep, num_t))
    assert out2.shape == (300, num_t)
    assert jnp.allclose(out2, _ref_mixed(x2, params), atol=2e-3, rtol=2e-3)
    assert jnp.allclose(out2, _ref_f32(x2, params), atol=5e-2, rtol=5e-2)

    print("KERNEL_OK")
</pallas_src>

<mosaic_0001>
module attributes {stable_mosaic.version = 11 : i64} {
  func.func @qnet_kernel(%arg0: i32, %arg1: memref<8x32xf32, #tpu.memory_space<vmem>>, %arg2: memref<32x256xbf16, #tpu.memory_space<vmem>>, %arg3: memref<1x256xf32, #tpu.memory_space<vmem>>, %arg4: memref<256x256xbf16, #tpu.memory_space<vmem>>, %arg5: memref<1x256xf32, #tpu.memory_space<vmem>>, %arg6: memref<256x128xbf16, #tpu.memory_space<vmem>>, %arg7: memref<1x128xf32, #tpu.memory_space<vmem>>, %arg8: memref<8x128xf32, #tpu.memory_space<vmem>>) attributes {dimension_semantics = [#tpu.dimension_semantics<parallel>], iteration_bounds = array<i64: 1>, scalar_prefetch = 0 : i64, scratch_operands = 0 : i64, tpu.core_type = #tpu.core_type<tc>, window_params = [{transform_indices = @transform_0, window_bounds = array<i64: 8, 32>}, {pipeline_mode = #tpu.pipeline_mode<synchronous>, transform_indices = @transform_1, window_bounds = array<i64: 32, 256>}, {pipeline_mode = #tpu.pipeline_mode<synchronous>, transform_indices = @transform_2, window_bounds = array<i64: 1, 256>}, {pipeline_mode = #tpu.pipeline_mode<synchronous>, transform_indices = @transform_3, window_bounds = array<i64: 256, 256>}, {pipeline_mode = #tpu.pipeline_mode<synchronous>, transform_indices = @transform_4, window_bounds = array<i64: 1, 256>}, {pipeline_mode = #tpu.pipeline_mode<synchronous>, transform_indices = @transform_5, window_bounds = array<i64: 256, 128>}, {pipeline_mode = #tpu.pipeline_mode<synchronous>, transform_indices = @transform_6, window_bounds = array<i64: 1, 128>}, {transform_indices = @transform_7, window_bounds = array<i64: 8, 128>}]} {
    %c0 = arith.constant 0 : index
    %c0_0 = arith.constant 0 : index
    %0 = vector.load %arg1[%c0, %c0_0] : memref<8x32xf32, #tpu.memory_space<vmem>>, vector<8x32xf32>
    %1 = arith.truncf %0 : vector<8x32xf32> to vector<8x32xbf16>
    %c0_1 = arith.constant 0 : index
    %c0_2 = arith.constant 0 : index
    %2 = vector.load %arg2[%c0_1, %c0_2] : memref<32x256xbf16, #tpu.memory_space<vmem>>, vector<32x256xbf16>
    %cst = arith.constant dense<0.000000e+00> : vector<8x256xf32>
    %3 = tpu.matmul %1, %2, %cst {dimension_numbers = #tpu.dot_dimension_numbers<[1], [0], [0], [1], [0, 0, 1, 1], [], []>} : vector<8x32xbf16>, vector<32x256xbf16>, vector<8x256xf32> -> vector<8x256xf32>
    %c0_3 = arith.constant 0 : index
    %c0_4 = arith.constant 0 : index
    %4 = vector.load %arg3[%c0_3, %c0_4] : memref<1x256xf32, #tpu.memory_space<vmem>>, vector<1x256xf32>
    %5 = vector.broadcast %4 : vector<1x256xf32> to vector<8x256xf32>
    %6 = arith.addf %3, %5 : vector<8x256xf32>
    %cst_5 = arith.constant 5.000000e-01 : f32
    %7 = vector.broadcast %cst_5 : f32 to vector<8x256xf32>
    %8 = arith.mulf %7, %6 : vector<8x256xf32>
    %9 = math.tanh %8 : vector<8x256xf32>
    %cst_6 = arith.constant 5.000000e-01 : f32
    %10 = vector.broadcast %cst_6 : f32 to vector<8x256xf32>
    %11 = arith.mulf %10, %9 : vector<8x256xf32>
    %cst_7 = arith.constant 5.000000e-01 : f32
    %12 = vector.broadcast %cst_7 : f32 to vector<8x256xf32>
    %13 = arith.addf %11, %12 : vector<8x256xf32>
    %14 = arith.truncf %13 : vector<8x256xf32> to vector<8x256xbf16>
    %c0_8 = arith.constant 0 : index
    %c0_9 = arith.constant 0 : index
    %15 = vector.load %arg4[%c0_8, %c0_9] : memref<256x256xbf16, #tpu.memory_space<vmem>>, vector<256x256xbf16>
    %cst_10 = arith.constant dense<0.000000e+00> : vector<8x256xf32>
    %16 = tpu.matmul %14, %15, %cst_10 {dimension_numbers = #tpu.dot_dimension_numbers<[1], [0], [0], [1], [0, 0, 1, 1], [], []>} : vector<8x256xbf16>, vector<256x256xbf16>, vector<8x256xf32> -> vector<8x256xf32>
    %c0_11 = arith.constant 0 : index
    %c0_12 = arith.constant 0 : index
    %17 = vector.load %arg5[%c0_11, %c0_12] : memref<1x256xf32, #tpu.memory_space<vmem>>, vector<1x256xf32>
    %18 = vector.broadcast %17 : vector<1x256xf32> to vector<8x256xf32>
    %19 = arith.addf %16, %18 : vector<8x256xf32>
    %cst_13 = arith.constant 5.000000e-01 : f32
    %20 = vector.broadcast %cst_13 : f32 to vector<8x256xf32>
    %21 = arith.mulf %20, %19 : vector<8x256xf32>
    %22 = math.tanh %21 : vector<8x256xf32>
    %cst_14 = arith.constant 5.000000e-01 : f32
    %23 = vector.broadcast %cst_14 : f32 to vector<8x256xf32>
    %24 = arith.mulf %23, %22 : vector<8x256xf32>
    %cst_15 = arith.constant 5.000000e-01 : f32
    %25 = vector.broadcast %cst_15 : f32 to vector<8x256xf32>
    %26 = arith.addf %24, %25 : vector<8x256xf32>
    %27 = arith.truncf %26 : vector<8x256xf32> to vector<8x256xbf16>
    %c0_16 = arith.constant 0 : index
    %c0_17 = arith.constant 0 : index
    %28 = vector.load %arg6[%c0_16, %c0_17] : memref<256x128xbf16, #tpu.memory_space<vmem>>, vector<256x128xbf16>
    %cst_18 = arith.constant dense<0.000000e+00> : vector<8x128xf32>
    %29 = tpu.matmul %27, %28, %cst_18 {dimension_numbers = #tpu.dot_dimension_numbers<[1], [0], [0], [1], [0, 0, 1, 1], [], []>} : vector<8x256xbf16>, vector<256x128xbf16>, vector<8x128xf32> -> vector<8x128xf32>
    %c0_19 = arith.constant 0 : index
    %c0_20 = arith.constant 0 : index
    %30 = vector.load %arg7[%c0_19, %c0_20] : memref<1x128xf32, #tpu.memory_space<vmem>>, vector<1x128xf32>
    %31 = vector.broadcast %30 : vector<1x128xf32> to vector<8x128xf32>
    %32 = arith.addf %29, %31 : vector<8x128xf32>
    %cst_21 = arith.constant dense<0xFF800000> : vector<8xf32>
    %33 = vector.multi_reduction <maximumf>, %32, %cst_21 [1] : vector<8x128xf32> to vector<8xf32>
    %34 = vector.shape_cast %33 : vector<8xf32> to vector<8x1xf32>
    %35 = vector.broadcast %34 : vector<8x1xf32> to vector<8x128xf32>
    %36 = arith.subf %32, %35 : vector<8x128xf32>
    %37 = math.exp %36 : vector<8x128xf32>
    %cst_22 = arith.constant dense<0.000000e+00> : vector<8xf32>
    %38 = vector.multi_reduction <add>, %37, %cst_22 [1] : vector<8x128xf32> to vector<8xf32>
    %39 = vector.shape_cast %38 : vector<8xf32> to vector<8x1xf32>
    %40 = math.log %39 : vector<8x1xf32>
    %41 = vector.broadcast %40 : vector<8x1xf32> to vector<8x128xf32>
    %42 = arith.subf %36, %41 : vector<8x128xf32>
    %c0_23 = arith.constant 0 : index
    %c0_24 = arith.constant 0 : index
    %43 = vector.load %arg8[%c0_23, %c0_24] : memref<8x128xf32, #tpu.memory_space<vmem>>, vector<8x128xf32>
    tpu.vector_store %arg8[%c0_23, %c0_24], %42 {strides = array<i32>} : memref<8x128xf32, #tpu.memory_space<vmem>>, vector<8x128xf32>,
    return
  }
  func.func @transform_0(%arg0: i32) -> (i32, i32) {
    %c0_i32 = arith.constant 0 : i32
    %c0_i32_0 = arith.constant 0 : i32
    return %arg0, %c0_i32 : i32, i32
  }
  func.func @transform_1(%arg0: i32) -> (i32, i32) {
    %c0_i32 = arith.constant 0 : i32
    %c0_i32_0 = arith.constant 0 : i32
    %c0_i32_1 = arith.constant 0 : i32
    return %c0_i32, %c0_i32_0 : i32, i32
  }
  func.func @transform_2(%arg0: i32) -> (i32, i32) {
    %c0_i32 = arith.constant 0 : i32
    %c0_i32_0 = arith.constant 0 : i32
    %c0_i32_1 = arith.constant 0 : i32
    return %c0_i32, %c0_i32_0 : i32, i32
  }
  func.func @transform_3(%arg0: i32) -> (i32, i32) {
    %c0_i32 = arith.constant 0 : i32
    %c0_i32_0 = arith.constant 0 : i32
    %c0_i32_1 = arith.constant 0 : i32
    return %c0_i32, %c0_i32_0 : i32, i32
  }
  func.func @transform_4(%arg0: i32) -> (i32, i32) {
    %c0_i32 = arith.constant 0 : i32
    %c0_i32_0 = arith.constant 0 : i32
    %c0_i32_1 = arith.constant 0 : i32
    return %c0_i32, %c0_i32_0 : i32, i32
  }
  func.func @transform_5(%arg0: i32) -> (i32, i32) {
    %c0_i32 = arith.constant 0 : i32
    %c0_i32_0 = arith.constant 0 : i32
    %c0_i32_1 = arith.constant 0 : i32
    return %c0_i32, %c0_i32_0 : i32, i32
  }
  func.func @transform_6(%arg0: i32) -> (i32, i32) {
    %c0_i32 = arith.constant 0 : i32
    %c0_i32_0 = arith.constant 0 : i32
    %c0_i32_1 = arith.constant 0 : i32
    return %c0_i32, %c0_i32_0 : i32, i32
  }
  func.func @transform_7(%arg0: i32) -> (i32, i32) {
    %c0_i32 = arith.constant 0 : i32
    %c0_i32_0 = arith.constant 0 : i32
    return %arg0, %c0_i32 : i32, i32
  }
}

</mosaic_0001>

<bundles_post_ra>
// kernel: qnetwork_forward.1
= control target key start
LH: loop header
LB: loop body
LE: loop exit
PB: predicated region body
PF: predicated region fallthrough
CT: control target
= control target key end

     0   :  { %12 = vsyncpa [#allocation3], 0  ;;  %s1043_s0 = inlined_call_operand.hbm [shape: f32[8,32], index: 0, kind: input, shape index: {}]   ;;  %s1044_s1 = inlined_call_operand.hbm [shape: bf16[32,256], index: 1, kind: input, shape index: {}]   ;;  %s1045_s2 = inlined_call_operand.vmem [shape: f32[1,256], index: 2, kind: input, shape index: {}]   ;;  %s1046_s3 = inlined_call_operand.hbm [shape: bf16[256,256], index: 3, kind: input, shape index: {}]   ;;  %s1047_s4 = inlined_call_operand.vmem [shape: f32[1,256], index: 4, kind: input, shape index: {}]   ;;  %s1048_s5 = inlined_call_operand.hbm [shape: bf16[256,128], index: 5, kind: input, shape index: {}]   ;;  %s1049_s6 = inlined_call_operand.vmem [shape: f32[1,128], index: 6, kind: input, shape index: {}]   ;;  %s1050_s7 = inlined_call_operand.hbm [shape: f32[8,128], index: 7, kind: output, shape index: {}]  }
   0x1   :  { %13 = vsyncpa [#allocation6], 0 }
   0x2   :  { %14 = vsyncpa [#allocation9], 0 }
   0x3   :  { %15 = vsyncpa [#allocation4], 0  ;;  %s918_s24 = smov [#allocation5]   ;;  %s800_s28 = scalar_lea.hbm %s1044_s1, 512 }
   0x4   :  { %s31_s25 = sshll.u32 %s918_s24, 4  ;;  %p801_p0 = scmp.ne.s32.totalorder %s1044_s1, %s800_s28  ;;  %s32_s25 = int_to_ptr.vmem [resolvable:$true] %s31_s25 }
   0x5   :  { %p804_p1 = scmp.lt.u32.totalorder %s800_s28, %s1044_s1 }
   0x7   :  { %p806_p2 = pnand %p804_p1, %p801_p0 }
   0x9   :  { %809 = shalt.err (!%p806_p2)
}
   0xa   :  { %s810_s10 = scalar_lea.vmem %s32_s25, 512  ;;  %p815_p4 = scmp.lt.s32.totalorder %s32_s25, %s32_s25 }
   0xb   :  { %p811_p3 = scmp.ne.s32.totalorder %s32_s25, %s810_s10  ;;  %p816_p5 = scmp.lt.s32.totalorder %s810_s10, %s810_s10 }
   0xd   :  { %p817_p6 = por %p816_p5, %p815_p4 }
   0xf   :  { %p818_p7 = pnand %p817_p6, %p811_p3 }
  0x11   :  { %821 = shalt.err (!%p818_p7)
}
  0x12   :  { %s919_s11 = smov 128   ;;  %s920_s12 = smov 8  }
  0x13   :  { %37 = dma.hbm_to_vmem [thread:$0]  %s1044_s1, 512, %s32_s25, [#allocation6], %s919_s11, %s919_s11, %s920_s12  }
  0x14   :  { %s921_s15 = smov [#allocation2]   ;;  %s922_s17 = smov [#allocation7]  }
  0x15   :  { %s22_s16 = sshll.u32 %s921_s15, 4  ;;  %s45_s18 = sshll.u32 %s922_s17, 4  ;;  %s23_s16 = int_to_ptr.vmem [resolvable:$true] %s22_s16  ;;  %s46_s18 = int_to_ptr.vmem [resolvable:$true] %s45_s18 }
  0x16   :  { %s822_s21 = scalar_lea.hbm %s1043_s0, 128 }
  0x17   :  { %p823_p8 = scmp.ne.s32.totalorder %s1043_s0, %s822_s21  ;;  %p826_p9 = scmp.lt.u32.totalorder %s822_s21, %s1043_s0 }
  0x19   :  { %p828_p10 = pnand %p826_p9, %p823_p8 }
  0x1b   :  { %831 = shalt.err (!%p828_p10)
}
  0x1c   :  { %s832_s1 = scalar_lea.vmem %s23_s16, 128  ;;  %p837_p12 = scmp.lt.s32.totalorder %s23_s16, %s23_s16 }
  0x1d   :  { %p833_p11 = scmp.ne.s32.totalorder %s23_s16, %s832_s1  ;;  %p838_p13 = scmp.lt.s32.totalorder %s832_s1, %s832_s1 }
  0x1f   :  { %p839_p0 = por %p838_p13, %p837_p12 }
  0x21   :  { %p840_p1 = pnand %p839_p0, %p833_p11 }
  0x23   :  { %843 = shalt.err (!%p840_p1)
}
  0x24   :  { %25 = dma.hbm_to_vmem [thread:$0]  %s1043_s0, 128, %s23_s16, [#allocation3]  }
  0x25   :  { %s844_s30 = scalar_lea.hbm %s1046_s3, 4096 }
  0x26   :  { %p845_p2 = scmp.ne.s32.totalorder %s1046_s3, %s844_s30  ;;  %p848_p3 = scmp.lt.u32.totalorder %s844_s30, %s1046_s3 }
  0x28   :  { %p850_p4 = pnand %p848_p3, %p845_p2 }
  0x2a   :  { %853 = shalt.err (!%p850_p4)
}
  0x2b   :  { %s854_s14 = scalar_lea.vmem %s46_s18, 4096  ;;  %p859_p6 = scmp.lt.s32.totalorder %s46_s18, %s46_s18 }
  0x2c   :  { %p855_p5 = scmp.ne.s32.totalorder %s46_s18, %s854_s14  ;;  %p860_p7 = scmp.lt.s32.totalorder %s854_s14, %s854_s14 }
  0x2e   :  { %p861_p8 = por %p860_p7, %p859_p6 }
  0x30   :  { %p862_p9 = pnand %p861_p8, %p855_p5 }
  0x32   :  { %865 = shalt.err (!%p862_p9)
}
  0x33   :  { %51 = dma.hbm_to_vmem [thread:$0]  %s1046_s3, 4096, %s46_s18, [#allocation6], %s919_s11, %s919_s11, %s920_s12  }
  0x34   :  { %s923_s16 = smov [#allocation8]   ;;  %s866_s21 = scalar_lea.hbm %s1048_s5, 2048 }
  0x35   :  { %s59_s17 = sshll.u32 %s923_s16, 4  ;;  %p867_p10 = scmp.ne.s32.totalorder %s1048_s5, %s866_s21  ;;  %s60_s17 = int_to_ptr.vmem [resolvable:$true] %s59_s17 }
  0x36   :  { %p870_p11 = scmp.lt.u32.totalorder %s866_s21, %s1048_s5 }
  0x38   :  { %p872_p12 = pnand %p870_p11, %p867_p10 }
  0x3a   :  { %875 = shalt.err (!%p872_p12)
}
  0x3b   :  { %s876_s1 = scalar_lea.vmem %s60_s17, 2048  ;;  %p881_p0 = scmp.lt.s32.totalorder %s60_s17, %s60_s17 }
  0x3c   :  { %p877_p13 = scmp.ne.s32.totalorder %s60_s17, %s876_s1  ;;  %p882_p1 = scmp.lt.s32.totalorder %s876_s1, %s876_s1 }
  0x3e   :  { %p883_p2 = por %p882_p1, %p881_p0 }
  0x40   :  { %p884_p3 = pnand %p883_p2, %p877_p13 }
  0x42   :  { %887 = shalt.err (!%p884_p3)
}
  0x43   :  { %s924_s3 = smov 64   ;;  %s925_s11 = smov 4  }
  0x44   :  { %65 = dma.hbm_to_vmem [thread:$0]  %s1048_s5, 2048, %s60_s17, [#allocation9], %s924_s3, %s924_s3, %s925_s11  }
  0x45   :  { %910 = dma.done.wait [#allocation3], 128  }
  0x46   :  { %911 = vsyncadd [#allocation3], 4294967168 }
  0x47   :  { %912 = dma.done.wait [#allocation6], 4608  }
  0x48   :  { %913 = vsyncadd [#allocation6], 4294962688 }
  0x49   :  { %914 = dma.done.wait [#allocation9], 2048  }
  0x4a   :  { %915 = vsyncadd [#allocation9], 4294965248  ;;  %v926_v0 = vmov 0   ;;  %v718_v1 = vld [vmem:[#allocation5 + $0x4] ss:$8 sps:$4 sm:$0xff]   ;;  %v81_v5 = vld [vmem:[#allocation2] sm:$0xff]  ;;  %v89_v43 = vlaneseq }
  0x4b   :  { %155 = vmatprep.mubr.bf16.mxu0 %v926_v0  ;;  %v720_v2 = vld [vmem:[#allocation5] ss:$8 sps:$4 sm:$0xff]   ;;  %123 = vmatprep.subr.bf16.mxu0 %v718_v1  ;;  %v721_v3 = vld [vmem:[#allocation5 + $0x14] ss:$8 sps:$4 sm:$0xff]   ;;  %v723_v4 = vld [vmem:[#allocation5 + $0x10] ss:$8 sps:$4 sm:$0xff]   ;;  %v82_v9 = vpack.c.bf16 %v81_v5, %v81_v5 }
  0x4c   :  { %124 = vmatpush1.bf16.msra.mxu0 %v720_v2  ;;  %v724_v6 = vld [vmem:[#allocation7 + $0x4] ss:$8 sps:$4 sm:$0xff]   ;;  %v726_v7 = vld [vmem:[#allocation7] ss:$8 sps:$4 sm:$0xff]   ;;  %v727_v8 = vld [vmem:[#allocation7 + $0x14] ss:$8 sps:$4 sm:$0xff]  }
  0x4d   :  { %125 = vmatprep.subr.bf16.mxu0 %v721_v3  ;;  %378 = vmatprep.subr.bf16.mxu1 %v724_v6  ;;  %v729_v10 = vld [vmem:[#allocation7 + $0x10] ss:$8 sps:$4 sm:$0xff]   ;;  %vm119_vm0 = vcmask 261120   ;;  %v730_v11 = vld [vmem:[#allocation7 + $0x24] ss:$8 sps:$4 sm:$0xff]   ;;  %v90_v44 = vshrl.u32 %v89_v43, 7 }
  0x4e   :  { %379 = vmatpush1.bf16.msra.mxu1 %v726_v7  ;;  %v732_v12 = vld [vmem:[#allocation7 + $0x20] ss:$8 sps:$4 sm:$0xff]   ;;  %v733_v13 = vld [vmem:[#allocation7 + $0x34] ss:$8 sps:$4 sm:$0xff]   ;;  %v735_v14 = vld [vmem:[#allocation7 + $0x30] ss:$8 sps:$4 sm:$0xff]  }
  0x4f   :  { %380 = vmatprep.subr.bf16.mxu1 %v727_v8  ;;  %v736_v15 = vld [vmem:[#allocation7 + $0x44] ss:$8 sps:$4 sm:$0xff]   ;;  %v738_v16 = vld [vmem:[#allocation7 + $0x40] ss:$8 sps:$4 sm:$0xff]   ;;  %v739_v17 = vld [vmem:[#allocation7 + $0x54] ss:$8 sps:$4 sm:$0xff]  }
  0x50   :  { %126 = vmatpush1.bf16.msra.mxu0 %v723_v4  ;;  %v741_v18 = vld [vmem:[#allocation7 + $0x50] ss:$8 sps:$4 sm:$0xff]   ;;  %v742_v19 = vld [vmem:[#allocation7 + $0x64] ss:$8 sps:$4 sm:$0xff]   ;;  %v744_v20 = vld [vmem:[#allocation7 + $0x60] ss:$8 sps:$4 sm:$0xff]  }
  0x51   :  { %v745_v21 = vld [vmem:[#allocation7 + $0x74] ss:$8 sps:$4 sm:$0xff]   ;;  %v747_v22 = vld [vmem:[#allocation7 + $0x70] ss:$8 sps:$4 sm:$0xff]   ;;  %v748_v23 = vld [vmem:[#allocation7 + $0x84] ss:$8 sps:$4 sm:$0xff]  }
  0x52   :  { %381 = vmatpush1.bf16.msra.mxu1 %v729_v10  ;;  %v750_v24 = vld [vmem:[#allocation7 + $0x80] ss:$8 sps:$4 sm:$0xff]   ;;  %v751_v25 = vld [vmem:[#allocation7 + $0x94] ss:$8 sps:$4 sm:$0xff]   ;;  %v753_v26 = vld [vmem:[#allocation7 + $0x90] ss:$8 sps:$4 sm:$0xff]  }
  0x53   :  { %636 = vmatmul.mubr.msk.bf16.vlgmr.msra.gmra.mrb[0].mxu0 %vm119_vm0, %v82_v9  ;;  %382 = vmatprep.subr.bf16.mxu1 %v730_v11  ;;  %v754_v27 = vld [vmem:[#allocation7 + $0xa4] ss:$8 sps:$4 sm:$0xff]   ;;  %v756_v28 = vld [vmem:[#allocation7 + $0xa0] ss:$8 sps:$4 sm:$0xff]   ;;  %v757_v29 = vld [vmem:[#allocation7 + $0xb4] ss:$8 sps:$4 sm:$0xff]  }
  0x54   :  { %v759_v30 = vld [vmem:[#allocation7 + $0xb0] ss:$8 sps:$4 sm:$0xff]   ;;  %v760_v31 = vld [vmem:[#allocation7 + $0xc4] ss:$8 sps:$4 sm:$0xff]   ;;  %v762_v32 = vld [vmem:[#allocation7 + $0xc0] ss:$8 sps:$4 sm:$0xff]  }
  0x55   :  { %v763_v33 = vld [vmem:[#allocation7 + $0xd4] ss:$8 sps:$4 sm:$0xff]   ;;  %v765_v34 = vld [vmem:[#allocation7 + $0xd0] ss:$8 sps:$4 sm:$0xff]   ;;  %v766_v35 = vld [vmem:[#allocation7 + $0xe4] ss:$8 sps:$4 sm:$0xff]  }
  0x56   :  { %383 = vmatpush1.bf16.msra.mxu1 %v732_v12  ;;  %v768_v36 = vld [vmem:[#allocation7 + $0xe0] ss:$8 sps:$4 sm:$0xff]   ;;  %v769_v37 = vld [vmem:[#allocation7 + $0xf4] ss:$8 sps:$4 sm:$0xff]   ;;  %v771_v38 = vld [vmem:[#allocation7 + $0xf0] ss:$8 sps:$4 sm:$0xff]  }
  0x57   :  { %384 = vmatprep.subr.bf16.mxu1 %v733_v13  ;;  %v772_v39 = vld [vmem:[#allocation8 + $0x40] sm:$0xff]   ;;  %v774_v41 = vld [vmem:[#allocation8 + $0x48] sm:$0xff]   ;;  %v91_v45 = vsub.s32 0, %v90_v44  ;;  %v87_v46 = vld [vmem:[%s1045_s2] sm:$0x3]  ;;  %v95_v47 = vsub.s32 1, %v90_v44 }
  0x58   :  { %v773_v40 = vld [vmem:[#allocation8] sm:$0xff]   ;;  %686 = vmatprep.subr.bf16.mxu0 %v772_v39  ;;  %v775_v42 = vld [vmem:[#allocation8 + $0x8] sm:$0xff]   ;;  %v776_v2 = vld [vmem:[#allocation8 + $0x50] sm:$0xff]   ;;  %s927_s29 = smov [#allocation10]  }
  0x59   :  { %687 = vmatpush3.bf16.msra.mxu0 %v773_v40  ;;  %v92_v48 = vrot.slane %v87_v46, %v91_v45  ;;  %v96_v49 = vrot.slane %v87_v46, %v95_v47  ;;  %v777_v3 = vld [vmem:[#allocation8 + $0x10] sm:$0xff]   ;;  %v778_v4 = vld [vmem:[#allocation8 + $0x58] sm:$0xff]   ;;  %v780_v6 = vld [vmem:[#allocation8 + $0x60] sm:$0xff]   ;;  %s621_s30 = sshll.u32 %s927_s29, 4  ;;  %s622_s30 = int_to_ptr.vmem [resolvable:$true] %s621_s30 }
  0x5a   :  { %385 = vmatpush1.bf16.msra.mxu1 %v735_v14  ;;  %688 = vmatprep.subr.bf16.mxu0 %v774_v41  ;;  %v779_v5 = vld [vmem:[#allocation8 + $0x18] sm:$0xff]   ;;  %v781_v7 = vld [vmem:[#allocation8 + $0x20] sm:$0xff]   ;;  %v782_v8 = vld [vmem:[#allocation8 + $0x68] sm:$0xff]   ;;  %p893_p5 = scmp.lt.s32.totalorder %s622_s30, %s622_s30 }
  0x5b   :  { %386 = vmatprep.subr.bf16.mxu1 %v736_v15  ;;  %v783_v9 = vld [vmem:[#allocation8 + $0x28] sm:$0xff]   ;;  %v784_v10 = vld [vmem:[#allocation8 + $0x70] sm:$0xff]   ;;  %v786_v12 = vld [vmem:[#allocation8 + $0x78] sm:$0xff]  }
  0x5c   :  { %v785_v11 = vld [vmem:[#allocation8 + $0x30] sm:$0xff]   ;;  %v787_v13 = vld [vmem:[#allocation8 + $0x38] sm:$0xff]  }
  0x5d   :  { %689 = vmatpush3.bf16.msra.mxu0 %v775_v42  ;;  %v206_v14 = vld [vmem:[%s1047_s4] sm:$0x3] }
  0x5e   :  { %387 = vmatpush1.bf16.msra.mxu1 %v738_v16  ;;  %690 = vmatprep.subr.bf16.mxu0 %v776_v2  ;;  %v211_v15 = vrot.slane %v206_v14, %v91_v45  ;;  %v215_v16 = vrot.slane %v206_v14, %v95_v47 }
  0x5f   :  { %388 = vmatprep.subr.bf16.mxu1 %v739_v17 }
  0x61   :  { %691 = vmatpush3.bf16.msra.mxu0 %v777_v3 }
  0x62   :  { %389 = vmatpush1.bf16.msra.mxu1 %v741_v18  ;;  %692 = vmatprep.subr.bf16.mxu0 %v778_v4 }
  0x63   :  { %390 = vmatprep.subr.bf16.mxu1 %v742_v19 }
  0x65   :  { %693 = vmatpush3.bf16.msra.mxu0 %v779_v5 }
  0x66   :  { %391 = vmatpush1.bf16.msra.mxu1 %v744_v20  ;;  %694 = vmatprep.subr.bf16.mxu0 %v780_v6 }
  0x67   :  { %392 = vmatprep.subr.bf16.mxu1 %v745_v21 }
  0x69   :  { %695 = vmatpush3.bf16.msra.mxu0 %v781_v7 }
  0x6a   :  { %393 = vmatpush1.bf16.msra.mxu1 %v747_v22  ;;  %696 = vmatprep.subr.bf16.mxu0 %v782_v8 }
  0x6b   :  { %394 = vmatprep.subr.bf16.mxu1 %v748_v23 }
  0x6d   :  { %697 = vmatpush3.bf16.msra.mxu0 %v783_v9 }
  0x6e   :  { %395 = vmatpush1.bf16.msra.mxu1 %v750_v24  ;;  %698 = vmatprep.subr.bf16.mxu0 %v784_v10 }
  0x6f   :  { %396 = vmatprep.subr.bf16.mxu1 %v751_v25 }
  0x71   :  { %699 = vmatpush3.bf16.msra.mxu0 %v785_v11 }
  0x72   :  { %397 = vmatpush1.bf16.msra.mxu1 %v753_v26  ;;  %700 = vmatprep.subr.bf16.mxu0 %v786_v12 }
  0x73   :  { %398 = vmatprep.subr.bf16.mxu1 %v754_v27 }
  0x75   :  { %701 = vmatpush3.bf16.msra.mxu0 %v787_v13 }
  0x76   :  { %399 = vmatpush1.bf16.msra.mxu1 %v756_v28 }
  0x77   :  { %400 = vmatprep.subr.bf16.mxu1 %v757_v29 }
  0x7a   :  { %401 = vmatpush1.bf16.msra.mxu1 %v759_v30 }
  0x7b   :  { %402 = vmatprep.subr.bf16.mxu1 %v760_v31 }
  0x7e   :  { %403 = vmatpush1.bf16.msra.mxu1 %v762_v32 }
  0x7f   :  { %404 = vmatprep.subr.bf16.mxu1 %v763_v33 }
  0x82   :  { %405 = vmatpush1.bf16.msra.mxu1 %v765_v34 }
  0x83   :  { %406 = vmatprep.subr.bf16.mxu1 %v766_v35  ;;  %v669_v35 = vld [vmem:[%s1049_s6] ss:$0 sm:$0xff]  ;;  %s888_s6 = scalar_lea.vmem %s622_s30, 128 }
  0x84   :  { %p889_p4 = scmp.ne.s32.totalorder %s622_s30, %s888_s6  ;;  %p894_p6 = scmp.lt.s32.totalorder %s888_s6, %s888_s6 }
  0x86   :  { %407 = vmatpush1.bf16.msra.mxu1 %v768_v36  ;;  %p895_p7 = por %p894_p6, %p893_p5 }
  0x87   :  { %408 = vmatprep.subr.bf16.mxu1 %v769_v37 }
  0x88   :  { %p896_p8 = pnand %p895_p7, %p889_p4 }
  0x8a   :  { %409 = vmatpush1.bf16.msra.mxu1 %v771_v38 }
 0x126   :  { %v157_v50 = vpop.f32.mrb[0].mxu0 }
 0x127   :  { %v158_v51 = vadd.f32 %v157_v50, %v92_v48  ;;  %v159_v52 = vpop.f32.mrb[1].mxu0 }
 0x128   :  { %v160_v53 = vadd.f32 %v159_v52, %v96_v49  ;;  %v161_v54 = vpop.f32.mrb[2].mxu0 }
 0x129   :  { %v164_v55 = vmul.f32 0.5, %v158_v51  ;;  %v162_v56 = vpop.f32.mrb[3].mxu0 }
 0x12a   :  { %v165_v57 = vmul.f32 0.5, %v160_v53 }
 0x12b   :  { %788 = vtanh.f32 %v164_v55 }
 0x12c   :  { %790 = vtanh.f32 %v165_v57 }
 0x135   :  { %v789_v58 = vpop.eup %788 }
 0x136   :  { %v791_v59 = vpop.eup %790  ;;  %v168_v60 = vmul.f32 0.5, %v789_v58 }
 0x137   :  { %v169_v61 = vmul.f32 0.5, %v791_v59 }
 0x138   :  { %v170_v62 = vadd.f32 0.5, %v168_v60 }
 0x139   :  { %v171_v63 = vadd.f32 0.5, %v169_v61 }
 0x13a   :  { %v172_v1 = vpack.c.bf16 %v170_v62, %v170_v62 }
 0x13b   :  { %v173_v0 = vpack.c.bf16 %v171_v63, %v171_v63 }
 0x13d   :  { %410 = vmatprep.mubr.bf16.mxu1 %v173_v0 }
 0x13e   :  { %411 = vmatmul.mubr.bf16.vlgmr.msra.gmra.mrb[0].mxu1 %v172_v1 }
 0x211   :  { %v412_v17 = vpop.f32.mrb[0].mxu1 }
 0x212   :  { %v413_v18 = vadd.f32 %v412_v17, %v211_v15  ;;  %v414_v19 = vpop.f32.mrb[1].mxu1 }
 0x213   :  { %v415_v20 = vadd.f32 %v414_v19, %v215_v16  ;;  %v416_v21 = vpop.f32.mrb[2].mxu1 }
 0x214   :  { %v419_v22 = vmul.f32 0.5, %v413_v18  ;;  %v417_v23 = vpop.f32.mrb[3].mxu1 }
 0x215   :  { %v420_v24 = vmul.f32 0.5, %v415_v20 }
 0x216   :  { %792 = vtanh.f32 %v419_v22 }
 0x217   :  { %794 = vtanh.f32 %v420_v24 }
 0x220   :  { %v793_v25 = vpop.eup %792 }
 0x221   :  { %v795_v26 = vpop.eup %794  ;;  %v423_v27 = vmul.f32 0.5, %v793_v25 }
 0x222   :  { %v424_v28 = vmul.f32 0.5, %v795_v26 }
 0x223   :  { %v425_v29 = vadd.f32 0.5, %v423_v27 }
 0x224   :  { %v426_v30 = vadd.f32 0.5, %v424_v28 }
 0x225   :  { %v427_v32 = vpack.c.bf16 %v425_v29, %v425_v29 }
 0x226   :  { %v428_v31 = vpack.c.bf16 %v426_v30, %v426_v30 }
 0x228   :  { %596 = vmatprep.mubr.bf16.mxu0 %v428_v31 }
 0x229   :  { %597 = vmatmul.mubr.bf16.vlgmr.msra.gmra.mrb[4].mxu0 %v427_v32 }
 0x2fc   :  { %v702_v33 = vpop.f32.mrb[4].mxu0 }
 0x2fd   :  { %v703_v34 = vpop.f32.mrb[5].mxu0 }
 0x2fe   :  { %v704_v36 = vadd.f32 %v703_v34, %v702_v33  ;;  %v705_v37 = vpop.f32.mrb[6].mxu0 }
 0x2ff   :  { %v706_v38 = vpop.f32.mrb[7].mxu0 }
 0x300   :  { %v599_v39 = vadd.f32 %v704_v36, %v669_v35 }
 0x302   :  { %604 = vmax.xlane.f32.xlu0 %v599_v39 }
 0x38f   :  { %v605_v40 = vpop.xlane.xlu0 %604 }
 0x390   :  { %v606_v41 = vsub.f32 %v599_v39, %v605_v40 }
 0x392   :  { %v607_v42 = vmul.f32 1.442695, %v606_v41 }
 0x394   :  { %796 = vpow2.f32 %v607_v42 }
 0x39e   :  { %v797_v43 = vpop.eup %796 }
 0x39f   :  { %609 = vadd.xlane.f32.xlu0 %v797_v43 }
 0x42c   :  { %v610_v44 = vpop.xlane.xlu0 %609 }
 0x42d   :  { %798 = vlog2.f32 %v610_v44 }
 0x437   :  { %v799_v45 = vpop.eup %798 }
 0x438   :  { %v612_v46 = vmul.f32 0.6931472, %v799_v45 }
 0x43a   :  { %v613_v47 = vsub.f32 %v606_v41, %v612_v46 }
 0x43c   :  { %614 = vst [vmem:[#allocation10] sm:$0xff] %v613_v47 }
 0x43d   :  { %899 = shalt.err (!%p896_p8)
}
 0x43e   :  { %s900_s10 = scalar_lea.hbm %s1050_s7, 128 }
 0x43f   :  { %p901_p9 = scmp.ne.s32.totalorder %s1050_s7, %s900_s10  ;;  %p904_p10 = scmp.lt.u32.totalorder %s900_s10, %s1050_s7 }
 0x441   :  { %p906_p11 = pnand %p904_p10, %p901_p9 }
 0x443   :  { %909 = shalt.err (!%p906_p11)
}
 0x444   :  { %624 = dma.vmem_to_hbm [thread:$0]  %s622_s30, 128, %s1050_s7, [#allocation4]  }
 0x445   :  { %916 = dma.done.wait [#allocation4], 128  }
 0x446   :  { %917 = vsyncadd [#allocation4], 4294967168 }
 0x447   :  { %628 = vsyncpa [#allocation3], 1 }
 0x448   :  { %629 = vsyncpa [#allocation6], 1 }
 0x449   :  { %630 = vsyncpa [#allocation9], 1 }
 0x44a   :  { %631 = vsyncpa [#allocation4], 1 }

</bundles_post_ra>
